<compile_context>
chip_gen: v6e
topology: v6e:2x2x1
jax: 0.10.0
libtpu: 0.0.40
codegen_flags: <defaults>
</compile_context>

<pallas_src>
import jax
import jax.numpy as jnp
from jax.experimental import pallas as pl
from jax.experimental.pallas import tpu as pltpu

OBS_SIZE = 10
HIDDEN = 128
NUM_EMB = 50
EMB_PAD = 64           # NUM_EMB padded (sublane multiple) for the one-hot gather matmul
XT_WIDTH = 16          # merged input row: cols 0:10 = x, col 10 = t (as float), rest 0
OUT_PAD = 16           # layer4 output padded to 16 lanes (64 B/row writeback)
MAX_TILE_B = 2048      # largest batch tile per grid step
MATMUL_DTYPE = jnp.bfloat16   # matmul operand dtype (accumulation is always f32)


def _softplus(x):
    # Stable softplus: max(x, 0) + log1p(exp(-|x|)).
    # Matches torch.nn.Softplus(beta=1, threshold=20) to < 2e-9.
    return jnp.maximum(x, 0.0) + jnp.log1p(jnp.exp(-jnp.abs(x)))


def shared_autonomy_kernel(xt_ref, emb_ref,
                           w1_ref, b1_ref, w2_ref, b2_ref,
                           w3_ref, b3_ref, w4_ref, b4_ref,
                           o_ref):
    xt = xt_ref[...]                                   # (T, 16) f32: x | t | zeros
    tile_rows = xt.shape[0]

    # ---- in-kernel embedding gather: bf16 one-hot (T, EMB_PAD) @ emb (EMB_PAD, 128) ----
    t_idx = xt[:, OBS_SIZE:OBS_SIZE + 1].astype(jnp.int32)           # (T, 1)
    lane_ids = jax.lax.broadcasted_iota(jnp.int32, (tile_rows, EMB_PAD), 1)
    onehot = (lane_ids == t_idx).astype(MATMUL_DTYPE)                # exact 0/1 in bf16
    t_emb = jnp.dot(onehot, emb_ref[...],
                    preferred_element_type=jnp.float32)              # (T, 128) f32

    # Biases loaded once (hoisted).
    b1 = b1_ref[...]
    b2 = b2_ref[...]
    b3 = b3_ref[...]
    b4 = b4_ref[...]

    # Layer 1: feed the whole merged row; w1 rows 10..15 are zero so the t column
    # (and padding) contributes exactly nothing.
    h = jnp.dot(xt.astype(MATMUL_DTYPE), w1_ref[...],
                preferred_element_type=jnp.float32) + b1
    h = _softplus(h * t_emb)

    h = jnp.dot(h.astype(MATMUL_DTYPE), w2_ref[...],
                preferred_element_type=jnp.float32) + b2
    h = _softplus(h * t_emb)

    h = jnp.dot(h.astype(MATMUL_DTYPE), w3_ref[...],
                preferred_element_type=jnp.float32) + b3
    h = _softplus(h * t_emb)

    out = jnp.dot(h.astype(MATMUL_DTYPE), w4_ref[...],
                  preferred_element_type=jnp.float32) + b4           # (T, OUT_PAD)
    o_ref[...] = out.astype(o_ref.dtype)


def _round_up(n, m):
    return ((n + m - 1) // m) * m


def _choose_tile_b(batch, max_tile_b=MAX_TILE_B):
    """Batch tile: as large as possible, but >= 2 grid steps for big batches (v7x TCs)."""
    b8 = _round_up(max(batch, 8), 8)
    if b8 <= 512:
        return b8                                   # one small tile; overhead negligible
    return min(max_tile_b, _round_up((b8 + 1) // 2, 8))


def prepare_params(params):
    """One-time parameter prep (padding + bf16 casts), hoisted out of the per-call path."""
    emb, w1, b1, w2, b2, w3, b3, w4, b4 = (
        params["emb"], params["w1"], params["b1"], params["w2"], params["b2"],
        params["w3"], params["b3"], params["w4"], params["b4"],
    )
    emb_p = jnp.zeros((EMB_PAD, HIDDEN), jnp.float32).at[:NUM_EMB].set(emb)
    w1_p = jnp.zeros((XT_WIDTH, HIDDEN), jnp.float32).at[:OBS_SIZE].set(w1)
    w4_p = jnp.zeros((HIDDEN, OUT_PAD), jnp.float32).at[:, :OBS_SIZE].set(w4)
    b4_p = jnp.zeros((1, OUT_PAD), jnp.float32).at[:, :OBS_SIZE].set(b4)
    return dict(
        emb=emb_p.astype(MATMUL_DTYPE),
        w1=w1_p.astype(MATMUL_DTYPE), b1=b1.astype(jnp.float32),
        w2=w2.astype(MATMUL_DTYPE), b2=b2.astype(jnp.float32),
        w3=w3.astype(MATMUL_DTYPE), b3=b3.astype(jnp.float32),
        w4=w4_p.astype(MATMUL_DTYPE), b4=b4_p,
    )


def shared_autonomy_forward(x, t, prepared, *, max_tile_b=MAX_TILE_B):
    """x: (B, obs_size) float32, t: (B,) time indices in [0, 50).

    Contract: out-of-range t yields a zero time embedding (torch's nn.Embedding would
    raise); callers must supply indices in [0, NUM_EMB).
    """
    B = x.shape[0]
    tile_b = _choose_tile_b(B, max_tile_b)
    n_tiles = (B + tile_b - 1) // tile_b
    B_pad = n_tiles * tile_b

    # Merged streamed input: cols 0:10 = x, col 10 = t (exact small integer in f32).
    xt = jnp.zeros((B_pad, XT_WIDTH), jnp.float32)
    xt = xt.at[:B, :OBS_SIZE].set(x.astype(jnp.float32))
    xt = xt.at[:B, OBS_SIZE].set(t.astype(jnp.float32))

    p = prepared
    grid = (n_tiles,)
    stream_in = pl.BlockSpec((tile_b, XT_WIDTH), lambda i: (i, 0))
    pinned = lambda a: pl.BlockSpec(a.shape, lambda i: (0, 0))   # resident across steps

    weight_bytes = sum(int(v.size) * v.dtype.itemsize for v in p.values())
    cost = pl.CostEstimate(
        flops=2 * B_pad * (EMB_PAD * HIDDEN + XT_WIDTH * HIDDEN
                           + 2 * HIDDEN * HIDDEN + HIDDEN * OUT_PAD),
        transcendentals=6 * HIDDEN * B_pad,        # exp + log1p, 3 gated layers
        bytes_accessed=B_pad * (XT_WIDTH + OUT_PAD) * 4 + weight_bytes,
    )

    out_pad = pl.pallas_call(
        shared_autonomy_kernel,
        out_shape=jax.ShapeDtypeStruct((B_pad, OUT_PAD), jnp.float32),
        grid=grid,
        in_specs=[
            stream_in,
            pinned(p["emb"]),
            pinned(p["w1"]), pinned(p["b1"]),
            pinned(p["w2"]), pinned(p["b2"]),
            pinned(p["w3"]), pinned(p["b3"]),
            pinned(p["w4"]), pinned(p["b4"]),
        ],
        out_specs=pl.BlockSpec((tile_b, OUT_PAD), lambda i: (i, 0)),
        compiler_params=pltpu.CompilerParams(dimension_semantics=("parallel",)),
        cost_estimate=cost,
    )(xt, p["emb"], p["w1"], p["b1"], p["w2"], p["b2"], p["w3"], p["b3"], p["w4"], p["b4"])

    return out_pad[:B, :OBS_SIZE]


def init_params(key):
    """Deterministic synthetic parameters; shapes follow the PyTorch module."""
    ks = jax.random.split(key, 5)

    def linear(kw, fan_in, fan_out):
        bound = 1.0 / jnp.sqrt(fan_in)
        kw1, kw2 = jax.random.split(kw)
        w = jax.random.uniform(kw1, (fan_in, fan_out), jnp.float32, -bound, bound)
        b = jax.random.uniform(kw2, (1, fan_out), jnp.float32, -bound, bound)
        return w, b

    w1, b1 = linear(ks[0], OBS_SIZE, HIDDEN)
    w2, b2 = linear(ks[1], HIDDEN, HIDDEN)
    w3, b3 = linear(ks[2], HIDDEN, HIDDEN)
    w4, b4 = linear(ks[3], HIDDEN, OBS_SIZE)
    emb = jax.random.normal(ks[4], (NUM_EMB, HIDDEN), jnp.float32)  # nn.Embedding ~ N(0,1)
    return dict(emb=emb, w1=w1, b1=b1, w2=w2, b2=b2, w3=w3, b3=b3, w4=w4, b4=b4)


def reference_forward(x, t, params, matmul_dtype=jnp.float32):
    """Pure-JAX reference. With matmul_dtype=bf16 it mirrors the kernel's compute dtype."""
    emb = params["emb"].astype(matmul_dtype).astype(jnp.float32)
    t_emb = jnp.take(emb, t.astype(jnp.int32), axis=0)

    def dot(a, w):
        return jnp.dot(a.astype(matmul_dtype), w.astype(matmul_dtype),
                       preferred_element_type=jnp.float32)

    sp = lambda v: jnp.maximum(v, 0.0) + jnp.log1p(jnp.exp(-jnp.abs(v)))
    h = sp((dot(x, params["w1"]) + params["b1"]) * t_emb)
    h = sp((dot(h, params["w2"]) + params["b2"]) * t_emb)
    h = sp((dot(h, params["w3"]) + params["b3"]) * t_emb)
    return dot(h, params["w4"]) + params["b4"]


if __name__ == "__main__":
    key = jax.random.PRNGKey(0)
    kx, kt, kp = jax.random.split(key, 3)

    params = init_params(kp)
    prepared = prepare_params(params)

    forward = jax.jit(shared_autonomy_forward)

    # Small-batch run (single tile).
    B = 8
    x = jax.random.normal(kx, (B, OBS_SIZE), jnp.float32)
    t = jax.random.randint(kt, (B,), 0, NUM_EMB, jnp.int32)
    out = jax.block_until_ready(forward(x, t, prepared))
    assert out.shape == (B, OBS_SIZE)

    # Tight check vs a compute-dtype-matched reference (bf16 operands / f32 accumulation).
    ref_matched = reference_forward(x, t, params, matmul_dtype=MATMUL_DTYPE)
    assert jnp.allclose(out, ref_matched, atol=1e-2, rtol=1e-2), "mismatch vs dtype-matched ref"

    # Loose sanity check vs full-f32 module semantics (bf16 matmul rounding only).
    ref_f32 = reference_forward(x, t, params, matmul_dtype=jnp.float32)
    assert jnp.allclose(out, ref_f32, atol=1e-1, rtol=1e-1), "mismatch vs f32 reference"

    # Multi-tile run (grid > 1): exercises pipelining + megacore sharding of the batch axis.
    B2 = 600
    x2 = jax.random.normal(jax.random.fold_in(kx, 1), (B2, OBS_SIZE), jnp.float32)
    t2 = jax.random.randint(jax.random.fold_in(kt, 1), (B2,), 0, NUM_EMB, jnp.int32)
    out2 = jax.block_until_ready(forward(x2, t2, prepared))
    assert out2.shape == (B2, OBS_SIZE)
    ref2 = reference_forward(x2, t2, params, matmul_dtype=MATMUL_DTYPE)
    assert jnp.allclose(out2, ref2, atol=1e-2, rtol=1e-2), "mismatch on multi-tile batch"

    print("KERNEL_OK")
</pallas_src>

<mosaic_0001>
module attributes {stable_mosaic.version = 11 : i64} {
  func.func @shared_autonomy_kernel(%arg0: i32, %arg1: memref<8x16xf32, #tpu.memory_space<vmem>>, %arg2: memref<64x128xbf16, #tpu.memory_space<vmem>>, %arg3: memref<16x128xbf16, #tpu.memory_space<vmem>>, %arg4: memref<1x128xf32, #tpu.memory_space<vmem>>, %arg5: memref<128x128xbf16, #tpu.memory_space<vmem>>, %arg6: memref<1x128xf32, #tpu.memory_space<vmem>>, %arg7: memref<128x128xbf16, #tpu.memory_space<vmem>>, %arg8: memref<1x128xf32, #tpu.memory_space<vmem>>, %arg9: memref<128x16xbf16, #tpu.memory_space<vmem>>, %arg10: memref<1x16xf32, #tpu.memory_space<vmem>>, %arg11: memref<8x16xf32, #tpu.memory_space<vmem>>) attributes {dimension_semantics = [#tpu.dimension_semantics<parallel>], iteration_bounds = array<i64: 1>, scalar_prefetch = 0 : i64, scratch_operands = 0 : i64, tpu.core_type = #tpu.core_type<tc>, window_params = [{transform_indices = @transform_0, window_bounds = array<i64: 8, 16>}, {pipeline_mode = #tpu.pipeline_mode<synchronous>, transform_indices = @transform_1, window_bounds = array<i64: 64, 128>}, {pipeline_mode = #tpu.pipeline_mode<synchronous>, transform_indices = @transform_2, window_bounds = array<i64: 16, 128>}, {pipeline_mode = #tpu.pipeline_mode<synchronous>, transform_indices = @transform_3, window_bounds = array<i64: 1, 128>}, {pipeline_mode = #tpu.pipeline_mode<synchronous>, transform_indices = @transform_4, window_bounds = array<i64: 128, 128>}, {pipeline_mode = #tpu.pipeline_mode<synchronous>, transform_indices = @transform_5, window_bounds = array<i64: 1, 128>}, {pipeline_mode = #tpu.pipeline_mode<synchronous>, transform_indices = @transform_6, window_bounds = array<i64: 128, 128>}, {pipeline_mode = #tpu.pipeline_mode<synchronous>, transform_indices = @transform_7, window_bounds = array<i64: 1, 128>}, {pipeline_mode = #tpu.pipeline_mode<synchronous>, transform_indices = @transform_8, window_bounds = array<i64: 128, 16>}, {pipeline_mode = #tpu.pipeline_mode<synchronous>, transform_indices = @transform_9, window_bounds = array<i64: 1, 16>}, {transform_indices = @transform_10, window_bounds = array<i64: 8, 16>}]} {
    %c0 = arith.constant 0 : index
    %c0_0 = arith.constant 0 : index
    %0 = vector.load %arg1[%c0, %c0_0] : memref<8x16xf32, #tpu.memory_space<vmem>>, vector<8x16xf32>
    %1 = vector.extract_strided_slice %0 {offsets = [0, 10], sizes = [8, 1], strides = [1, 1]} : vector<8x16xf32> to vector<8x1xf32>
    %2 = arith.fptosi %1 : vector<8x1xf32> to vector<8x1xi32>
    %3 = tpu.iota {dimensions = array<i32: 1>} : vector<8x64xi32>
    %4 = vector.broadcast %2 : vector<8x1xi32> to vector<8x64xi32>
    %5 = arith.cmpi eq, %3, %4 : vector<8x64xi32>
    %6 = arith.extui %5 : vector<8x64xi1> to vector<8x64xi32>
    %7 = arith.sitofp %6 : vector<8x64xi32> to vector<8x64xf32>
    %8 = arith.truncf %7 : vector<8x64xf32> to vector<8x64xbf16>
    %c0_1 = arith.constant 0 : index
    %c0_2 = arith.constant 0 : index
    %9 = vector.load %arg2[%c0_1, %c0_2] : memref<64x128xbf16, #tpu.memory_space<vmem>>, vector<64x128xbf16>
    %cst = arith.constant dense<0.000000e+00> : vector<8x128xf32>
    %10 = tpu.matmul %8, %9, %cst {dimension_numbers = #tpu.dot_dimension_numbers<[1], [0], [0], [1], [0, 0, 1, 1], [], []>} : vector<8x64xbf16>, vector<64x128xbf16>, vector<8x128xf32> -> vector<8x128xf32>
    %c0_3 = arith.constant 0 : index
    %c0_4 = arith.constant 0 : index
    %11 = vector.load %arg4[%c0_3, %c0_4] : memref<1x128xf32, #tpu.memory_space<vmem>>, vector<1x128xf32>
    %c0_5 = arith.constant 0 : index
    %c0_6 = arith.constant 0 : index
    %12 = vector.load %arg6[%c0_5, %c0_6] : memref<1x128xf32, #tpu.memory_space<vmem>>, vector<1x128xf32>
    %c0_7 = arith.constant 0 : index
    %c0_8 = arith.constant 0 : index
    %13 = vector.load %arg8[%c0_7, %c0_8] : memref<1x128xf32, #tpu.memory_space<vmem>>, vector<1x128xf32>
    %c0_9 = arith.constant 0 : index
    %c0_10 = arith.constant 0 : index
    %14 = vector.load %arg10[%c0_9, %c0_10] : memref<1x16xf32, #tpu.memory_space<vmem>>, vector<1x16xf32>
    %15 = arith.truncf %0 : vector<8x16xf32> to vector<8x16xbf16>
    %c0_11 = arith.constant 0 : index
    %c0_12 = arith.constant 0 : index
    %16 = vector.load %arg3[%c0_11, %c0_12] : memref<16x128xbf16, #tpu.memory_space<vmem>>, vector<16x128xbf16>
    %cst_13 = arith.constant dense<0.000000e+00> : vector<8x128xf32>
    %17 = tpu.matmul %15, %16, %cst_13 {dimension_numbers = #tpu.dot_dimension_numbers<[1], [0], [0], [1], [0, 0, 1, 1], [], []>} : vector<8x16xbf16>, vector<16x128xbf16>, vector<8x128xf32> -> vector<8x128xf32>
    %18 = vector.broadcast %11 : vector<1x128xf32> to vector<8x128xf32>
    %19 = arith.addf %17, %18 : vector<8x128xf32>
    %20 = arith.mulf %19, %10 : vector<8x128xf32>
    %cst_14 = arith.constant 0.000000e+00 : f32
    %21 = vector.broadcast %cst_14 : f32 to vector<8x128xf32>
    %22 = arith.maximumf %20, %21 : vector<8x128xf32>
    %23 = math.absf %20 : vector<8x128xf32>
    %cst_15 = arith.constant 0.000000e+00 : f32
    %24 = vector.broadcast %cst_15 : f32 to vector<8x128xf32>
    %25 = arith.subf %24, %23 : vector<8x128xf32>
    %26 = math.exp %25 : vector<8x128xf32>
    %27 = math.log1p %26 : vector<8x128xf32>
    %28 = arith.addf %22, %27 : vector<8x128xf32>
    %29 = arith.truncf %28 : vector<8x128xf32> to vector<8x128xbf16>
    %c0_16 = arith.constant 0 : index
    %c0_17 = arith.constant 0 : index
    %30 = vector.load %arg5[%c0_16, %c0_17] : memref<128x128xbf16, #tpu.memory_space<vmem>>, vector<128x128xbf16>
    %cst_18 = arith.constant dense<0.000000e+00> : vector<8x128xf32>
    %31 = tpu.matmul %29, %30, %cst_18 {dimension_numbers = #tpu.dot_dimension_numbers<[1], [0], [0], [1], [0, 0, 1, 1], [], []>} : vector<8x128xbf16>, vector<128x128xbf16>, vector<8x128xf32> -> vector<8x128xf32>
    %32 = vector.broadcast %12 : vector<1x128xf32> to vector<8x128xf32>
    %33 = arith.addf %31, %32 : vector<8x128xf32>
    %34 = arith.mulf %33, %10 : vector<8x128xf32>
    %cst_19 = arith.constant 0.000000e+00 : f32
    %35 = vector.broadcast %cst_19 : f32 to vector<8x128xf32>
    %36 = arith.maximumf %34, %35 : vector<8x128xf32>
    %37 = math.absf %34 : vector<8x128xf32>
    %cst_20 = arith.constant 0.000000e+00 : f32
    %38 = vector.broadcast %cst_20 : f32 to vector<8x128xf32>
    %39 = arith.subf %38, %37 : vector<8x128xf32>
    %40 = math.exp %39 : vector<8x128xf32>
    %41 = math.log1p %40 : vector<8x128xf32>
    %42 = arith.addf %36, %41 : vector<8x128xf32>
    %43 = arith.truncf %42 : vector<8x128xf32> to vector<8x128xbf16>
    %c0_21 = arith.constant 0 : index
    %c0_22 = arith.constant 0 : index
    %44 = vector.load %arg7[%c0_21, %c0_22] : memref<128x128xbf16, #tpu.memory_space<vmem>>, vector<128x128xbf16>
    %cst_23 = arith.constant dense<0.000000e+00> : vector<8x128xf32>
    %45 = tpu.matmul %43, %44, %cst_23 {dimension_numbers = #tpu.dot_dimension_numbers<[1], [0], [0], [1], [0, 0, 1, 1], [], []>} : vector<8x128xbf16>, vector<128x128xbf16>, vector<8x128xf32> -> vector<8x128xf32>
    %46 = vector.broadcast %13 : vector<1x128xf32> to vector<8x128xf32>
    %47 = arith.addf %45, %46 : vector<8x128xf32>
    %48 = arith.mulf %47, %10 : vector<8x128xf32>
    %cst_24 = arith.constant 0.000000e+00 : f32
    %49 = vector.broadcast %cst_24 : f32 to vector<8x128xf32>
    %50 = arith.maximumf %48, %49 : vector<8x128xf32>
    %51 = math.absf %48 : vector<8x128xf32>
    %cst_25 = arith.constant 0.000000e+00 : f32
    %52 = vector.broadcast %cst_25 : f32 to vector<8x128xf32>
    %53 = arith.subf %52, %51 : vector<8x128xf32>
    %54 = math.exp %53 : vector<8x128xf32>
    %55 = math.log1p %54 : vector<8x128xf32>
    %56 = arith.addf %50, %55 : vector<8x128xf32>
    %57 = arith.truncf %56 : vector<8x128xf32> to vector<8x128xbf16>
    %c0_26 = arith.constant 0 : index
    %c0_27 = arith.constant 0 : index
    %58 = vector.load %arg9[%c0_26, %c0_27] : memref<128x16xbf16, #tpu.memory_space<vmem>>, vector<128x16xbf16>
    %cst_28 = arith.constant dense<0.000000e+00> : vector<8x16xf32>
    %59 = tpu.matmul %57, %58, %cst_28 {dimension_numbers = #tpu.dot_dimension_numbers<[1], [0], [0], [1], [0, 0, 1, 1], [], []>} : vector<8x128xbf16>, vector<128x16xbf16>, vector<8x16xf32> -> vector<8x16xf32>
    %60 = vector.broadcast %14 : vector<1x16xf32> to vector<8x16xf32>
    %61 = arith.addf %59, %60 : vector<8x16xf32>
    %c0_29 = arith.constant 0 : index
    %c0_30 = arith.constant 0 : index
    %62 = vector.load %arg11[%c0_29, %c0_30] : memref<8x16xf32, #tpu.memory_space<vmem>>, vector<8x16xf32>
    tpu.vector_store %arg11[%c0_29, %c0_30], %61 {strides = array<i32>} : memref<8x16xf32, #tpu.memory_space<vmem>>, vector<8x16xf32>,
    return
  }
  func.func @transform_0(%arg0: i32) -> (i32, i32) {
    %c0_i32 = arith.constant 0 : i32
    %c0_i32_0 = arith.constant 0 : i32
    return %arg0, %c0_i32 : i32, i32
  }
  func.func @transform_1(%arg0: i32) -> (i32, i32) {
    %c0_i32 = arith.constant 0 : i32
    %c0_i32_0 = arith.constant 0 : i32
    %c0_i32_1 = arith.constant 0 : i32
    return %c0_i32, %c0_i32_0 : i32, i32
  }
  func.func @transform_2(%arg0: i32) -> (i32, i32) {
    %c0_i32 = arith.constant 0 : i32
    %c0_i32_0 = arith.constant 0 : i32
    %c0_i32_1 = arith.constant 0 : i32
    return %c0_i32, %c0_i32_0 : i32, i32
  }
  func.func @transform_3(%arg0: i32) -> (i32, i32) {
    %c0_i32 = arith.constant 0 : i32
    %c0_i32_0 = arith.constant 0 : i32
    %c0_i32_1 = arith.constant 0 : i32
    return %c0_i32, %c0_i32_0 : i32, i32
  }
  func.func @transform_4(%arg0: i32) -> (i32, i32) {
    %c0_i32 = arith.constant 0 : i32
    %c0_i32_0 = arith.constant 0 : i32
    %c0_i32_1 = arith.constant 0 : i32
    return %c0_i32, %c0_i32_0 : i32, i32
  }
  func.func @transform_5(%arg0: i32) -> (i32, i32) {
    %c0_i32 = arith.constant 0 : i32
    %c0_i32_0 = arith.constant 0 : i32
    %c0_i32_1 = arith.constant 0 : i32
    return %c0_i32, %c0_i32_0 : i32, i32
  }
  func.func @transform_6(%arg0: i32) -> (i32, i32) {
    %c0_i32 = arith.constant 0 : i32
    %c0_i32_0 = arith.constant 0 : i32
    %c0_i32_1 = arith.constant 0 : i32
    return %c0_i32, %c0_i32_0 : i32, i32
  }
  func.func @transform_7(%arg0: i32) -> (i32, i32) {
    %c0_i32 = arith.constant 0 : i32
    %c0_i32_0 = arith.constant 0 : i32
    %c0_i32_1 = arith.constant 0 : i32
    return %c0_i32, %c0_i32_0 : i32, i32
  }
  func.func @transform_8(%arg0: i32) -> (i32, i32) {
    %c0_i32 = arith.constant 0 : i32
    %c0_i32_0 = arith.constant 0 : i32
    %c0_i32_1 = arith.constant 0 : i32
    return %c0_i32, %c0_i32_0 : i32, i32
  }
  func.func @transform_9(%arg0: i32) -> (i32, i32) {
    %c0_i32 = arith.constant 0 : i32
    %c0_i32_0 = arith.constant 0 : i32
    %c0_i32_1 = arith.constant 0 : i32
    return %c0_i32, %c0_i32_0 : i32, i32
  }
  func.func @transform_10(%arg0: i32) -> (i32, i32) {
    %c0_i32 = arith.constant 0 : i32
    %c0_i32_0 = arith.constant 0 : i32
    return %arg0, %c0_i32 : i32, i32
  }
}

</mosaic_0001>

<bundles_post_ra>
// kernel: shared_autonomy_forward.1
= control target key start
LH: loop header
LB: loop body
LE: loop exit
PB: predicated region body
PF: predicated region fallthrough
CT: control target
= control target key end

     0   :  { %15 = vsyncpa [#allocation3], 0  ;;  %s1083_s0 = inlined_call_operand.vmem [shape: f32[8,16], index: 0, kind: input, shape index: {}]   ;;  %s1084_s1 = inlined_call_operand.hbm [shape: bf16[64,128], index: 1, kind: input, shape index: {}]   ;;  %s1085_s2 = inlined_call_operand.vmem [shape: bf16[16,128], index: 2, kind: input, shape index: {}]   ;;  %s1086_s3 = inlined_call_operand.vmem [shape: f32[1,128], index: 3, kind: input, shape index: {}]   ;;  %s1087_s4 = inlined_call_operand.vmem [shape: bf16[128,128], index: 4, kind: input, shape index: {}]   ;;  %s1088_s5 = inlined_call_operand.hbm [shape: f32[1,128], index: 5, kind: input, shape index: {}]   ;;  %s1089_s6 = inlined_call_operand.vmem [shape: bf16[128,128], index: 6, kind: input, shape index: {}]   ;;  %s1090_s7 = inlined_call_operand.vmem [shape: f32[1,128], index: 7, kind: input, shape index: {}]   ;;  %s1091_s8 = inlined_call_operand.vmem [shape: bf16[128,16], index: 8, kind: input, shape index: {}]   ;;  %s1092_s9 = inlined_call_operand.vmem [shape: f32[1,16], index: 9, kind: input, shape index: {}]   ;;  %s1093_s10 = inlined_call_operand.hbm [shape: f32[8,16], index: 10, kind: output, shape index: {}]  }
   0x1   :  { %16 = vsyncpa [#allocation6], 0 }
   0x2   :  { %17 = vsyncpa [#allocation4], 0  ;;  %s877_s13 = smov [#allocation2]  }
   0x3   :  { %s25_s14 = sshll.u32 %s877_s13, 4  ;;  %s26_s14 = int_to_ptr.vmem [resolvable:$true] %s25_s14 }
   0x4   :  { %s819_s15 = scalar_lea.vmem %s26_s14, 512  ;;  %p824_p1 = scmp.lt.s32.totalorder %s26_s14, %s26_s14 }
   0x5   :  { %p820_p0 = scmp.ne.s32.totalorder %s26_s14, %s819_s15  ;;  %p825_p2 = scmp.lt.s32.totalorder %s819_s15, %s819_s15 }
   0x7   :  { %p826_p3 = por %p825_p2, %p824_p1 }
   0x9   :  { %p827_p4 = pnand %p826_p3, %p820_p0 }
   0xb   :  { %830 = shalt.err (!%p827_p4)
}
   0xc   :  { %s878_s16 = smov 64   ;;  %s879_s17 = smov 4  }
   0xd   :  { %31 = dma.hbm_to_vmem [thread:$0]  %s1084_s1, 512, %s26_s14, [#allocation3], %s878_s16, %s878_s16, %s879_s17  }
   0xe   :  { %s880_s20 = smov [#allocation5]  }
   0xf   :  { %s44_s21 = sshll.u32 %s880_s20, 4  ;;  %s45_s21 = int_to_ptr.vmem [resolvable:$true] %s44_s21 }
  0x10   :  { %s839_s22 = scalar_lea.vmem %s45_s21, 16  ;;  %s843_s23 = scalar_lea.vmem %s45_s21, 32 }
  0x11   :  { %p840_p5 = scmp.ne.s32.totalorder %s45_s21, %s839_s22  ;;  %p844_p6 = scmp.lt.s32.totalorder %s45_s21, %s45_s21 }
  0x12   :  { %p845_p7 = scmp.lt.s32.totalorder %s843_s23, %s839_s22 }
  0x14   :  { %p846_p8 = por %p845_p7, %p844_p6 }
  0x16   :  { %p847_p9 = pnand %p846_p8, %p840_p5 }
  0x18   :  { %850 = shalt.err (!%p847_p9)
}
  0x19   :  { %47 = dma.hbm_to_vmem [thread:$0]  %s1088_s5, 16, %s45_s21, [#allocation6]  }
  0x1a   :  { %871 = dma.done.wait [#allocation3], 512  }
  0x1b   :  { %872 = vsyncadd [#allocation3], 4294966784 }
  0x1c   :  { %873 = dma.done.wait [#allocation6], 16  }
  0x1d   :  { %874 = vsyncadd [#allocation6], 4294967280  ;;  %v881_v0 = vmov 10   ;;  %v882_v1 = vmov 0.0   ;;  %v63_v2 = vld [vmem:[%s1083_s0] sm:$0xff]  ;;  %v770_v4 = vld [vmem:[#allocation2 + $0x18] sm:$0xff]   ;;  %v65_v9 = vlaneseq }
  0x1e   :  { %769 = vset.pattern.permute.xlu0 %v881_v0  ;;  %681 = vmatprep.subr.bf16.mxu0 %v882_v1  ;;  %v759_v3 = vtrunc.f32 %v63_v2  ;;  %v771_v6 = vld [vmem:[#allocation2 + $0x10] sm:$0xff]   ;;  %vm883_vm0 = vmmov 0   ;;  %v772_v7 = vld [vmem:[#allocation2 + $0x8] sm:$0xff]   ;;  %v773_v8 = vld [vmem:[#allocation2] sm:$0xff]   ;;  %vm106_vm2 = vcmask 523264   ;;  %v154_v15 = vpack.c.bf16 %v63_v2, %v63_v2  ;;  %s884_s5 = smov [#allocation7]  }
  0x1f   :  { %699 = vmatprep.subr.bf16.mxu1 %v882_v1  ;;  %682 = vmatpush3.bf16.msra.mxu0 %v770_v4  ;;  %v66_v10 = vand.u32 127, %v65_v9  ;;  %v774_v13 = vld [vmem:[%s1085_s2] sm:$0xff]   ;;  %vm169_vm3 = vcmask 130048   ;;  %v775_v16 = vld [vmem:[%s1087_s4 + $0x38] sm:$0xff]   ;;  %v776_v17 = vld [vmem:[%s1087_s4 + $0x30] sm:$0xff]   ;;  %s601_s27 = sshll.u32 %s884_s5, 4  ;;  %s602_s27 = int_to_ptr.vmem [resolvable:$true] %s601_s27 }
  0x20   :  { %v760_v5 = vcvt.f32.s32 %v759_v3  ;;  %683 = vmatprep.subr.bf16.mxu0 %v882_v1  ;;  %689 = vmatprep.mubr.msk.bf16.mxu0 %vm883_vm0, %v882_v1  ;;  %v777_v18 = vld [vmem:[%s1087_s4 + $0x28] sm:$0xff]   ;;  %v778_v19 = vld [vmem:[%s1087_s4 + $0x20] sm:$0xff]   ;;  %v779_v20 = vld [vmem:[%s1087_s4 + $0x18] sm:$0xff]   ;;  %s851_s28 = scalar_lea.vmem %s602_s27, 128  ;;  %p856_p11 = scmp.lt.s32.totalorder %s602_s27, %s602_s27 }
  0x21   :  { %715 = vmatprep.mubr.msk.bf16.mxu1 %vm883_vm0, %v882_v1  ;;  %700 = vmatpush3.bf16.msra.mxu1 %v775_v16  ;;  %v780_v21 = vld [vmem:[%s1087_s4 + $0x10] sm:$0xff]   ;;  %v781_v22 = vld [vmem:[%s1087_s4 + $0x8] sm:$0xff]   ;;  %v782_v23 = vld [vmem:[%s1087_s4] sm:$0xff]   ;;  %p852_p10 = scmp.ne.s32.totalorder %s602_s27, %s851_s28  ;;  %p857_p12 = scmp.lt.s32.totalorder %s851_s28, %s851_s28 }
  0x22   :  { %68 = vperm.xlu0 %769, %v760_v5   ;;  %701 = vmatprep.subr.bf16.mxu1 %v882_v1  ;;  %v617_v28 = vld [vmem:[%s1086_s3] ss:$0 sm:$0xff]  ;;  %v783_v50 = vld [vmem:[%s1089_s6 + $0x38] sm:$0xff]   ;;  %v784_v51 = vld [vmem:[%s1089_s6 + $0x30] sm:$0xff]  }
  0x23   :  { %684 = vmatpush3.bf16.msra.mxu0 %v771_v6  ;;  %v785_v52 = vld [vmem:[%s1089_s6 + $0x28] sm:$0xff]   ;;  %v786_v53 = vld [vmem:[%s1089_s6 + $0x20] sm:$0xff]   ;;  %v787_v54 = vld [vmem:[%s1089_s6 + $0x18] sm:$0xff]   ;;  %p858_p13 = por %p857_p12, %p856_p11 }
  0x24   :  { %685 = vmatprep.subr.bf16.mxu0 %v882_v1  ;;  %v788_v55 = vld [vmem:[%s1089_s6 + $0x10] sm:$0xff]   ;;  %v789_v56 = vld [vmem:[%s1089_s6 + $0x8] sm:$0xff]   ;;  %v790_v57 = vld [vmem:[%s1089_s6] sm:$0xff]  }
  0x25   :  { %702 = vmatpush3.bf16.msra.mxu1 %v776_v17  ;;  %v620_v58 = vld [vmem:[#allocation5] ss:$0 sm:$0xff]  ;;  %v791_v17 = vld [vmem:[%s1091_s8 + $0x38] sm:$0xff]   ;;  %p859_p0 = pnand %p858_p13, %p852_p10 }
  0x26   :  { %703 = vmatprep.subr.bf16.mxu1 %v882_v1 }
  0x27   :  { %686 = vmatpush3.bf16.msra.mxu0 %v772_v7 }
  0x28   :  { %687 = vmatprep.subr.bf16.mxu0 %v882_v1 }
  0x29   :  { %704 = vmatpush3.bf16.msra.mxu1 %v777_v18  ;;  %v792_v18 = vld [vmem:[%s1091_s8 + $0x30] sm:$0xff]  }
  0x2a   :  { %705 = vmatprep.subr.bf16.mxu1 %v882_v1 }
  0x2b   :  { %688 = vmatpush3.bf16.msra.mxu0 %v773_v8 }
  0x2c   :  { %693 = vmatprep.subr.bf16.mxu0 %v882_v1 }
  0x2d   :  { %706 = vmatpush3.bf16.msra.mxu1 %v778_v19  ;;  %v793_v19 = vld [vmem:[%s1091_s8 + $0x28] sm:$0xff]  }
  0x2e   :  { %707 = vmatprep.subr.bf16.mxu1 %v882_v1 }
  0x31   :  { %708 = vmatpush3.bf16.msra.mxu1 %v779_v20  ;;  %v794_v20 = vld [vmem:[%s1091_s8 + $0x20] sm:$0xff]  }
  0x32   :  { %709 = vmatprep.subr.bf16.mxu1 %v882_v1 }
  0x35   :  { %710 = vmatpush3.bf16.msra.mxu1 %v780_v21  ;;  %v795_v21 = vld [vmem:[%s1091_s8 + $0x18] sm:$0xff]  }
  0x36   :  { %711 = vmatprep.subr.bf16.mxu1 %v882_v1 }
  0x39   :  { %712 = vmatpush3.bf16.msra.mxu1 %v781_v22  ;;  %v796_v22 = vld [vmem:[%s1091_s8 + $0x10] sm:$0xff]  }
  0x3a   :  { %713 = vmatprep.subr.bf16.mxu1 %v882_v1 }
  0x3d   :  { %714 = vmatpush3.bf16.msra.mxu1 %v782_v23  ;;  %v797_v23 = vld [vmem:[%s1091_s8 + $0x8] sm:$0xff]  }
  0x3e   :  { %739 = vmatprep.subr.bf16.mxu1 %v882_v1 }
  0x9d   :  { %v69_v11 = vpop.permute.xlu0 %68 }
  0x9e   :  { %vm70_vm1 = vcmp.eq.s32.totalorder %v66_v10, %v69_v11 }
  0x9f   :  { %v611_v12 = vsel %vm70_vm1, 1.0, %v882_v1 }
  0xa0   :  { %v73_v14 = vpack.c.bf16 %v611_v12, %v611_v12 }
  0xa2   :  { %690 = vmatmul.mubr.msk.bf16.vlgmr.msra.gmra.mxu0 %vm106_vm2, %v73_v14 }
  0xa3   :  { %694 = vmatpush3.bf16.msra.mxu0 %v774_v13  ;;  %695 = vmatprep.mubr.msk.bf16.mxu0 %vm883_vm0, %v882_v1 }
  0xa4   :  { %719 = vmatprep.subr.bf16.mxu0 %v882_v1 }
  0xaa   :  { %696 = vmatmul.mubr.msk.bf16.vlgmr.msra.gmra.mxu0 %vm169_vm3, %v154_v15 }
  0xab   :  { %735 = vmatprep.mubr.msk.bf16.mxu0 %vm883_vm0, %v882_v1  ;;  %720 = vmatpush3.bf16.msra.mxu0 %v783_v50 }
  0xac   :  { %721 = vmatprep.subr.bf16.mxu0 %v882_v1 }
  0xaf   :  { %722 = vmatpush3.bf16.msra.mxu0 %v784_v51 }
  0xb0   :  { %723 = vmatprep.subr.bf16.mxu0 %v882_v1 }
  0xb3   :  { %724 = vmatpush3.bf16.msra.mxu0 %v785_v52 }
  0xb4   :  { %725 = vmatprep.subr.bf16.mxu0 %v882_v1 }
  0xb7   :  { %726 = vmatpush3.bf16.msra.mxu0 %v786_v53 }
  0xb8   :  { %727 = vmatprep.subr.bf16.mxu0 %v882_v1 }
  0xbb   :  { %728 = vmatpush3.bf16.msra.mxu0 %v787_v54 }
  0xbc   :  { %729 = vmatprep.subr.bf16.mxu0 %v882_v1 }
  0xbf   :  { %730 = vmatpush3.bf16.msra.mxu0 %v788_v55 }
  0xc0   :  { %731 = vmatprep.subr.bf16.mxu0 %v882_v1 }
  0xc3   :  { %732 = vmatpush3.bf16.msra.mxu0 %v789_v56 }
  0xc4   :  { %733 = vmatprep.subr.bf16.mxu0 %v882_v1 }
  0xc7   :  { %734 = vmatpush3.bf16.msra.mxu0 %v790_v57 }
 0x162   :  { %v1001_v24 = vpop.f32.mrf.mxu0 }
 0x164   :  { %v691_v25 = vpop.f32.mrf.mxu0 }
 0x165   :  { %v798_v25 = vld [vmem:[%s1091_s8] sm:$0xff]  }
 0x166   :  { %v147_v26 = vpop.f32.mrf.mxu0 }
 0x167   :  { %v629_v26 = vld [vmem:[%s1090_s7] ss:$0 sm:$0xff] }
 0x168   :  { %v692_v27 = vpop.f32.mrf.mxu0 }
 0x16a   :  { %v207_v29 = vpop.f32.mrf.mxu0 }
 0x16b   :  { %v208_v30 = vadd.f32 %v617_v28, %v207_v29 }
 0x16c   :  { %v697_v31 = vpop.f32.mrf.mxu0 }
 0x16d   :  { %v213_v32 = vmul.f32 %v208_v30, %v1001_v24 }
 0x16e   :  { %v210_v33 = vpop.f32.mrf.mxu0 }
 0x16f   :  { %v215_v34 = vand.u32 2147483647, %v213_v32  ;;  %v214_v46 = vmax.f32 %v213_v32, 0.0 }
 0x170   :  { %v698_v35 = vpop.f32.mrf.mxu0 }
 0x171   :  { %v216_v36 = vsub.f32 0.0, %v215_v34 }
 0x173   :  { %v217_v37 = vmul.f32 1.442695, %v216_v36 }
 0x175   :  { %799 = vpow2.f32 %v217_v37 }
 0x182   :  { %v800_v38 = vpop.eup %799 }
 0x183   :  { %v219_v39 = vadd.f32 1.0, %v800_v38  ;;  %v222_v40 = vmul.f32 -0.5, %v800_v38  ;;  %v225_v42 = vand.u32 2147483647, %v800_v38 }
 0x185   :  { %801 = vlog2.f32 %v219_v39  ;;  %v223_v41 = vadd.f32 1.0, %v222_v40  ;;  %vm226_vm4 = vcmp.lt.f32.partialorder %v225_v42, 0.0004427343 }
 0x187   :  { %v224_v45 = vmul.f32 %v800_v38, %v223_v41 }
 0x192   :  { %v802_v43 = vpop.eup %801 }
 0x193   :  { %v221_v44 = vmul.f32 0.6931472, %v802_v43 }
 0x195   :  { %v227_v47 = vsel %vm226_vm4, %v224_v45, %v221_v44 }
 0x196   :  { %v228_v48 = vadd.f32 %v227_v47, %v214_v46  ;;  %v638_v46 = vld [vmem:[%s1092_s9] ss:$0 sm:$0xff] }
 0x198   :  { %v229_v49 = vpack.c.bf16 %v228_v48, %v228_v48 }
 0x19a   :  { %716 = vmatmul.mubr.bf16.vlgmr.msra.gmra.mxu1 %v229_v49 }
 0x19b   :  { %755 = vmatprep.mubr.msk.bf16.mxu1 %vm883_vm0, %v882_v1  ;;  %740 = vmatpush3.bf16.msra.mxu1 %v791_v17 }
 0x19c   :  { %741 = vmatprep.subr.bf16.mxu1 %v882_v1 }
 0x19f   :  { %742 = vmatpush3.bf16.msra.mxu1 %v792_v18 }
 0x1a0   :  { %743 = vmatprep.subr.bf16.mxu1 %v882_v1 }
 0x1a3   :  { %744 = vmatpush3.bf16.msra.mxu1 %v793_v19 }
 0x1a4   :  { %745 = vmatprep.subr.bf16.mxu1 %v882_v1 }
 0x1a7   :  { %746 = vmatpush3.bf16.msra.mxu1 %v794_v20 }
 0x1a8   :  { %747 = vmatprep.subr.bf16.mxu1 %v882_v1 }
 0x1ab   :  { %748 = vmatpush3.bf16.msra.mxu1 %v795_v21 }
 0x1ac   :  { %749 = vmatprep.subr.bf16.mxu1 %v882_v1 }
 0x1af   :  { %750 = vmatpush3.bf16.msra.mxu1 %v796_v22 }
 0x1b0   :  { %751 = vmatprep.subr.bf16.mxu1 %v882_v1 }
 0x1b3   :  { %752 = vmatpush3.bf16.msra.mxu1 %v797_v23 }
 0x1b4   :  { %753 = vmatprep.subr.bf16.mxu1 %v882_v1 }
 0x1b7   :  { %754 = vmatpush3.bf16.msra.mxu1 %v798_v25 }
 0x25a   :  { %v334_v59 = vpop.f32.mrf.mxu1 }
 0x25b   :  { %v335_v60 = vadd.f32 %v620_v58, %v334_v59 }
 0x25c   :  { %v717_v61 = vpop.f32.mrf.mxu1 }
 0x25d   :  { %v340_v62 = vmul.f32 %v335_v60, %v1001_v24 }
 0x25e   :  { %v337_v63 = vpop.f32.mrf.mxu1 }
 0x25f   :  { %v342_v0 = vand.u32 2147483647, %v340_v62  ;;  %v341_v13 = vmax.f32 %v340_v62, 0.0 }
 0x260   :  { %v718_v2 = vpop.f32.mrf.mxu1 }
 0x261   :  { %v343_v3 = vsub.f32 0.0, %v342_v0 }
 0x263   :  { %v344_v4 = vmul.f32 1.442695, %v343_v3 }
 0x265   :  { %803 = vpow2.f32 %v344_v4 }
 0x272   :  { %v804_v5 = vpop.eup %803 }
 0x273   :  { %v346_v6 = vadd.f32 1.0, %v804_v5  ;;  %v349_v7 = vmul.f32 -0.5, %v804_v5  ;;  %v352_v9 = vand.u32 2147483647, %v804_v5 }
 0x275   :  { %805 = vlog2.f32 %v346_v6  ;;  %v350_v8 = vadd.f32 1.0, %v349_v7  ;;  %vm353_vm5 = vcmp.lt.f32.partialorder %v352_v9, 0.0004427343 }
 0x277   :  { %v351_v12 = vmul.f32 %v804_v5, %v350_v8 }
 0x282   :  { %v806_v10 = vpop.eup %805 }
 0x283   :  { %v348_v11 = vmul.f32 0.6931472, %v806_v10 }
 0x285   :  { %v354_v14 = vsel %vm353_vm5, %v351_v12, %v348_v11 }
 0x286   :  { %v355_v15 = vadd.f32 %v354_v14, %v341_v13 }
 0x288   :  { %v356_v16 = vpack.c.bf16 %v355_v15, %v355_v15 }
 0x28a   :  { %736 = vmatmul.mubr.bf16.vlgmr.msra.gmra.mxu0 %v356_v16 }
 0x34a   :  { %v461_v27 = vpop.f32.mrf.mxu0 }
 0x34b   :  { %v462_v28 = vadd.f32 %v629_v26, %v461_v27 }
 0x34c   :  { %v737_v29 = vpop.f32.mrf.mxu0 }
 0x34d   :  { %v467_v30 = vmul.f32 %v462_v28, %v1001_v24 }
 0x34e   :  { %v464_v31 = vpop.f32.mrf.mxu0 }
 0x34f   :  { %v469_v32 = vand.u32 2147483647, %v467_v30  ;;  %v468_v43 = vmax.f32 %v467_v30, 0.0 }
 0x350   :  { %v738_v33 = vpop.f32.mrf.mxu0 }
 0x351   :  { %v470_v34 = vsub.f32 0.0, %v469_v32 }
 0x353   :  { %v471_v35 = vmul.f32 1.442695, %v470_v34 }
 0x355   :  { %807 = vpow2.f32 %v471_v35 }
 0x362   :  { %v808_v1 = vpop.eup %807 }
 0x363   :  { %v473_v36 = vadd.f32 1.0, %v808_v1  ;;  %v476_v37 = vmul.f32 -0.5, %v808_v1  ;;  %v479_v39 = vand.u32 2147483647, %v808_v1 }
 0x365   :  { %809 = vlog2.f32 %v473_v36  ;;  %v477_v38 = vadd.f32 1.0, %v476_v37  ;;  %vm480_vm6 = vcmp.lt.f32.partialorder %v479_v39, 0.0004427343 }
 0x367   :  { %v478_v42 = vmul.f32 %v808_v1, %v477_v38 }
 0x372   :  { %v810_v40 = vpop.eup %809 }
 0x373   :  { %v475_v41 = vmul.f32 0.6931472, %v810_v40 }
 0x375   :  { %v481_v44 = vsel %vm480_vm6, %v478_v42, %v475_v41 }
 0x376   :  { %v482_v45 = vadd.f32 %v481_v44, %v468_v43 }
 0x378   :  { %v483_v24 = vpack.c.bf16 %v482_v45, %v482_v45 }
 0x37a   :  { %756 = vmatmul.mubr.bf16.vlgmr.msra.gmra.mxu1 %v483_v24 }
 0x43a   :  { %v588_v47 = vpop.f32.mrf.mxu1 }
 0x43b   :  { %v589_v48 = vadd.f32 %v638_v46, %v588_v47 }
 0x43c   :  { %v757_v49 = vpop.f32.mrf.mxu1 }
 0x43d   :  { %594 = vst.msk [vmem:[#allocation7] sm:$0xff] %vm169_vm3, %v589_v48 }
 0x43e   :  { %v591_v50 = vpop.f32.mrf.mxu1 }
 0x43f   :  { %862 = shalt.err (!%p859_p0)
}
 0x440   :  { %604 = dma.vmem_to_hbm [thread:$0]  %s602_s27, 128, %s1093_s10, [#allocation4]   ;;  %v758_v51 = vpop.f32.mrf.mxu1 }
 0x441   :  { %875 = dma.done.wait [#allocation4], 128  }
 0x442   :  { %876 = vsyncadd [#allocation4], 4294967168 }
 0x443   :  { %608 = vsyncpa [#allocation3], 1 }
 0x444   :  { %609 = vsyncpa [#allocation6], 1 }
 0x445   :  { %610 = vsyncpa [#allocation4], 1 }

</bundles_post_ra>
